<compile_context>
chip_gen: v7x
topology: tpu7x:2x2x1
jax: 0.10.0
libtpu: 0.0.40
codegen_flags: <defaults>
</compile_context>

<pallas_src>
import functools

import jax
import jax.numpy as jnp
from jax.experimental import pallas as pl
from jax.experimental.pallas import tpu as pltpu


# ----------------------------------------------------------------------------
# Pallas kernel: TB batch elements (TB * K_pad rows) per grid step.
# ----------------------------------------------------------------------------
def _context_cluster_kernel(ab_ref,                      # SMEM: [2] = (alpha, beta)
                            x_ref,                       # VMEM: [R, Dp]        (R = TB*Kp)
                            w1v_ref, b1v_ref,            # [Dp, 2*HHDp], [1, 2*HHDp]
                            w2_ref, b2_ref,              # [HHDp, Dp],   [1, Dp]
                            m_ch_ref,                    # [HHDp, H]  channel -> head (reduce)
                            m_hc_ref,                    # [H, HHDp]  head -> channels (broadcast)
                            s_rt_ref,                    # [R, TB]    row -> segment (broadcast)
                            s_tr_ref,                    # [TB, R]    segment -> valid rows (reduce)
                            o_ref,                       # VMEM: [R, Dp]
                            *, k, hhd_p):
    f32 = jnp.float32
    alpha = ab_ref[0]
    beta = ab_ref[1]

    x = x_ref[...]                                       # native dtype, [R, Dp]

    # ---- fused fc1 | fc_v: one wide MXU matmul, f32 accumulate -------------
    y = jnp.dot(x, w1v_ref[...], preferred_element_type=f32) \
        + b1v_ref[...].astype(f32)                       # [R, 2*HHDp]
    xp = y[:, :hhd_p]                                    # [R, HHDp] (lane-aligned view)
    v = y[:, hhd_p:]                                     # [R, HHDp]

    m_ch = m_ch_ref[...]
    m_hc = m_hc_ref[...]
    s_rt = s_rt_ref[...]
    s_tr = s_tr_ref[...]                                 # zero cols for K-pad rows

    # ---- per-(batch, head) cluster centers (segment mean over the K points)
    inv_k = 1.0 / k
    center = jnp.dot(s_tr, xp, preferred_element_type=f32) * inv_k    # [TB, HHDp]
    vcenter = jnp.dot(s_tr, v, preferred_element_type=f32) * inv_k    # [TB, HHDp]

    # ---- cosine similarity, all heads at once -------------------------------
    eps = 1e-12
    xsq = jnp.dot(xp * xp, m_ch, preferred_element_type=f32)          # [R, H]
    csq = jnp.dot(center * center, m_ch, preferred_element_type=f32)  # [TB, H]
    inv_xn = jax.lax.rsqrt(jnp.maximum(xsq, eps * eps))               # [R, H]
    inv_cn = jax.lax.rsqrt(jnp.maximum(csq, eps * eps))               # [TB, H]

    # normalize the center once at [TB, HHDp] granularity, then broadcast rows
    center_n = center * jnp.dot(inv_cn, m_hc, preferred_element_type=f32)   # [TB, HHDp]
    center_rows = jnp.dot(s_rt, center_n, preferred_element_type=f32)       # [R, HHDp]
    dot_xc = jnp.dot(xp * center_rows, m_ch, preferred_element_type=f32)    # [R, H]
    cos = dot_xc * inv_xn                                                    # [R, H]

    # NOTE: the source writes `nn.ReLU(tensor)` (constructs a module); the
    # intended semantics is an elementwise ReLU, implemented here.
    sim = jnp.maximum(beta + alpha * cos, 0.0)                               # [R, H]

    # ---- weighted aggregation -----------------------------------------------
    sim_exp = jnp.dot(sim, m_hc, preferred_element_type=f32)                 # [R, HHDp]
    wsum = jnp.dot(s_tr, v * sim_exp, preferred_element_type=f32)            # [TB, HHDp]
    ssum = jnp.dot(s_tr, sim, preferred_element_type=f32)                    # [TB, H]
    denom = jnp.dot(ssum, m_hc, preferred_element_type=f32) + 1.0            # [TB, HHDp]
    agg = (wsum + vcenter) * pl.reciprocal(denom, approx=True)               # [TB, HHDp]

    # ---- dispatch back to points, fc2, residual -----------------------------
    agg_rows = jnp.dot(s_rt, agg, preferred_element_type=f32)                # [R, HHDp]
    out_pre = sim_exp * agg_rows                                             # [R, HHDp]
    out = jnp.dot(out_pre.astype(w2_ref.dtype), w2_ref[...],
                  preferred_element_type=f32) + b2_ref[...].astype(f32)      # [R, Dp]

    o_ref[...] = (x.astype(f32) + out).astype(o_ref.dtype)


# ----------------------------------------------------------------------------
# Wrapper
# ----------------------------------------------------------------------------
def _round_up(a, m):
    return (a + m - 1) // m * m


def context_cluster(x_bdk, params, *, heads, head_dim, block_b=None):
    """x_bdk: [B, dim, K] (PyTorch 'b d k' convention). Returns [B, dim, K]."""
    B, D, K = x_bdk.shape
    hhd = heads * head_dim
    w1, b1, wv, bv, w2, b2, alpha, beta = params
    f32 = jnp.float32

    # -------- lane-dense padding targets --------------------------------------
    D_p = _round_up(D, 128)
    HHD_p = _round_up(hhd, 128)
    K_p = _round_up(K, 8)

    # -------- pack + pad weights (padded channels are zero => inert) ----------
    w1_p = jnp.zeros((D_p, HHD_p), w1.dtype).at[:D, :hhd].set(w1)
    wv_p = jnp.zeros((D_p, HHD_p), wv.dtype).at[:D, :hhd].set(wv)
    w1v = jnp.concatenate([w1_p, wv_p], axis=1)                    # [Dp, 2*HHDp]
    b1_p = jnp.zeros((1, HHD_p), b1.dtype).at[:, :hhd].set(b1)
    bv_p = jnp.zeros((1, HHD_p), bv.dtype).at[:, :hhd].set(bv)
    b1v = jnp.concatenate([b1_p, bv_p], axis=1)                    # [1, 2*HHDp]
    w2_p = jnp.zeros((HHD_p, D_p), w2.dtype).at[:hhd, :D].set(w2)
    b2_p = jnp.zeros((1, D_p), b2.dtype).at[:, :D].set(b2)

    # -------- VMEM-aware row tile (block_b batch elements per grid step) ------
    if block_b is None:
        # rough live f32 working set per row inside the kernel
        per_row_bytes = 4 * (2 * D_p + 12 * HHD_p)
        rows_budget = 20 << 20                       # keep intermediates ~<=20 MiB
        cap_b = max(1, rows_budget // (per_row_bytes * K_p))
        block_b = min(B, cap_b)
        if B >= 2:                                   # >=2 grid steps (v7x: 2 TCs)
            block_b = min(block_b, B // 2)
        block_b = max(block_b, 1)
        while B % block_b:
            block_b -= 1
    assert B % block_b == 0 and block_b >= 1
    rows = block_b * K_p                             # multiple of 8 (K_p is)

    # -------- grid-invariant masks, built once in the wrapper ------------------
    seg = jnp.arange(rows) // K_p                                   # row -> segment
    valid = (jnp.arange(rows) % K_p) < K                            # K-pad rows masked
    s_rt = (seg[:, None] == jnp.arange(block_b)[None, :]).astype(f32)          # [R, TB]
    s_tr = ((jnp.arange(block_b)[:, None] == seg[None, :])
            & valid[None, :]).astype(f32)                                       # [TB, R]
    ch = jnp.arange(HHD_p)
    m_ch = (((ch // head_dim)[:, None] == jnp.arange(heads)[None, :])
            & (ch < hhd)[:, None]).astype(f32)                                  # [HHDp, H]
    m_hc = m_ch.T                                                               # [H, HHDp]

    # -------- activations: one transpose in, pad K/D, free 2-D view -----------
    x_bkd = jnp.transpose(x_bdk, (0, 2, 1))                         # [B, K, D]
    if K_p != K or D_p != D:
        x_bkd = jnp.pad(x_bkd, ((0, 0), (0, K_p - K), (0, D_p - D)))
    x2d = x_bkd.reshape(B * K_p, D_p)

    ab = jnp.stack([jnp.reshape(alpha, ()), jnp.reshape(beta, ())]).astype(f32)

    # -------- explicit VMEM budget ---------------------------------------------
    weights_bytes = (w1v.size * w1v.dtype.itemsize + b1v.size * b1v.dtype.itemsize
                     + w2_p.size * w2_p.dtype.itemsize + b2_p.size * b2_p.dtype.itemsize)
    masks_bytes = 4 * (s_rt.size + s_tr.size + m_ch.size + m_hc.size)
    block_bytes = rows * D_p * x2d.dtype.itemsize
    interm_bytes = rows * (2 * D_p + 12 * HHD_p) * 4
    vmem = int(2 * (weights_bytes + masks_bytes + 2 * block_bytes)
               + 1.5 * interm_bytes) + (4 << 20)
    vmem = min(max(vmem, 16 << 20), 48 << 20)        # stay inside v7x's 64 MiB

    kernel = functools.partial(_context_cluster_kernel, k=K, hhd_p=HHD_p)

    out2d = pl.pallas_call(
        kernel,
        out_shape=jax.ShapeDtypeStruct((B * K_p, D_p), x_bdk.dtype),
        grid=(B // block_b,),
        in_specs=[
            pl.BlockSpec(memory_space=pltpu.MemorySpace.SMEM),     # alpha/beta
            pl.BlockSpec((rows, D_p), lambda i: (i, 0)),           # x rows
            pl.BlockSpec((D_p, 2 * HHD_p), lambda i: (0, 0)),      # W1|Wv fused
            pl.BlockSpec((1, 2 * HHD_p), lambda i: (0, 0)),        # b1|bv
            pl.BlockSpec((HHD_p, D_p), lambda i: (0, 0)),          # W2
            pl.BlockSpec((1, D_p), lambda i: (0, 0)),              # b2
            pl.BlockSpec((HHD_p, heads), lambda i: (0, 0)),        # m_ch
            pl.BlockSpec((heads, HHD_p), lambda i: (0, 0)),        # m_hc
            pl.BlockSpec((rows, block_b), lambda i: (0, 0)),       # s_rt
            pl.BlockSpec((block_b, rows), lambda i: (0, 0)),       # s_tr
        ],
        out_specs=pl.BlockSpec((rows, D_p), lambda i: (i, 0)),
        compiler_params=pltpu.CompilerParams(
            dimension_semantics=("parallel",),
            vmem_limit_bytes=vmem),
    )(ab, x2d, w1v, b1v, w2_p, b2_p, m_ch, m_hc, s_rt, s_tr)

    out = out2d.reshape(B, K_p, D_p)[:, :K, :D]
    return jnp.transpose(out, (0, 2, 1))                           # [B, D, K]


# ----------------------------------------------------------------------------
# Pure-JAX reference (mirrors the PyTorch forward) for a correctness check.
# ----------------------------------------------------------------------------
def context_cluster_ref(x_bdk, params, *, heads, head_dim):
    w1, b1, wv, bv, w2, b2, alpha, beta = params
    B, D, K = x_bdk.shape
    x = jnp.transpose(x_bdk, (0, 2, 1))                            # [B, K, D]
    value = x @ wv + bv
    xp = x @ w1 + b1
    xp = xp.reshape(B, K, heads, head_dim).transpose(0, 2, 1, 3).reshape(B * heads, K, head_dim)
    value = value.reshape(B, K, heads, head_dim).transpose(0, 2, 1, 3).reshape(B * heads, K, head_dim)
    center = xp.mean(axis=1, keepdims=True)
    vcenter = value.mean(axis=1, keepdims=True)
    eps = 1e-12
    cn = center / jnp.maximum(jnp.linalg.norm(center, axis=-1, keepdims=True), eps)
    xn = xp / jnp.maximum(jnp.linalg.norm(xp, axis=-1, keepdims=True), eps)
    cos = jnp.einsum('bmd,bnd->bmn', cn, xn)                       # [BH, 1, K]
    sim = jax.nn.relu(beta + alpha * cos)
    out = ((value[:, None] * sim[..., None]).sum(axis=2) + vcenter) / (
        sim.sum(axis=-1, keepdims=True) + 1.0)
    out = out * sim[:, 0][..., None]
    out = out.reshape(B, heads, K, head_dim).transpose(0, 2, 1, 3).reshape(B, K, heads * head_dim)
    out = out @ w2 + b2
    return x_bdk + jnp.transpose(out, (0, 2, 1))


if __name__ == "__main__":
    B, DIM, K = 2, 16, 8
    HEADS, HEAD_DIM = 4, 8
    HHD = HEADS * HEAD_DIM

    key = jax.random.PRNGKey(0)
    k_x, k_w1, k_b1, k_wv, k_bv, k_w2, k_b2 = jax.random.split(key, 7)

    x = jax.random.normal(k_x, (B, DIM, K), dtype=jnp.float32)

    # nn.Linear weights stored transposed as [in, out] so y = x @ W + b.
    w1 = 0.1 * jax.random.normal(k_w1, (DIM, HHD), dtype=jnp.float32)
    b1 = 0.1 * jax.random.normal(k_b1, (1, HHD), dtype=jnp.float32)
    wv = 0.1 * jax.random.normal(k_wv, (DIM, HHD), dtype=jnp.float32)
    bv = 0.1 * jax.random.normal(k_bv, (1, HHD), dtype=jnp.float32)
    w2 = 0.1 * jax.random.normal(k_w2, (HHD, DIM), dtype=jnp.float32)
    b2 = 0.1 * jax.random.normal(k_b2, (1, DIM), dtype=jnp.float32)
    alpha = jnp.ones((1,), dtype=jnp.float32)    # sim_alpha init
    beta = jnp.zeros((1,), dtype=jnp.float32)    # sim_beta init
    params = (w1, b1, wv, bv, w2, b2, alpha, beta)

    out = context_cluster(x, params, heads=HEADS, head_dim=HEAD_DIM)
    out = jax.block_until_ready(out)

    ref = context_cluster_ref(x, params, heads=HEADS, head_dim=HEAD_DIM)
    assert out.shape == (B, DIM, K)
    # loose tolerance: MXU matmuls / approx reciprocal use reduced precision
    assert jnp.allclose(out, ref, rtol=5e-2, atol=5e-2), (
        f"max abs err = {jnp.max(jnp.abs(out - ref))}")

    print("KERNEL_OK")
</pallas_src>

<mosaic_0001>
module attributes {stable_mosaic.version = 11 : i64} {
  func.func @_context_cluster_kernel(%arg0: i32, %arg1: memref<2xf32, #tpu.memory_space<smem>>, %arg2: memref<8x128xf32, #tpu.memory_space<vmem>>, %arg3: memref<128x256xf32, #tpu.memory_space<vmem>>, %arg4: memref<1x256xf32, #tpu.memory_space<vmem>>, %arg5: memref<128x128xf32, #tpu.memory_space<vmem>>, %arg6: memref<1x128xf32, #tpu.memory_space<vmem>>, %arg7: memref<128x4xf32, #tpu.memory_space<vmem>>, %arg8: memref<4x128xf32, #tpu.memory_space<vmem>>, %arg9: memref<8x1xf32, #tpu.memory_space<vmem>>, %arg10: memref<1x8xf32, #tpu.memory_space<vmem>>, %arg11: memref<8x128xf32, #tpu.memory_space<vmem>>) attributes {dimension_semantics = [#tpu.dimension_semantics<parallel>], iteration_bounds = array<i64: 2>, scalar_prefetch = 0 : i64, scratch_operands = 0 : i64, tpu.core_type = #tpu.core_type<tc>, window_params = [{transform_indices = @transform_0, window_bounds = array<i64: 2>}, {transform_indices = @transform_1, window_bounds = array<i64: 8, 128>}, {pipeline_mode = #tpu.pipeline_mode<synchronous>, transform_indices = @transform_2, window_bounds = array<i64: 128, 256>}, {pipeline_mode = #tpu.pipeline_mode<synchronous>, transform_indices = @transform_3, window_bounds = array<i64: 1, 256>}, {pipeline_mode = #tpu.pipeline_mode<synchronous>, transform_indices = @transform_4, window_bounds = array<i64: 128, 128>}, {pipeline_mode = #tpu.pipeline_mode<synchronous>, transform_indices = @transform_5, window_bounds = array<i64: 1, 128>}, {pipeline_mode = #tpu.pipeline_mode<synchronous>, transform_indices = @transform_6, window_bounds = array<i64: 128, 4>}, {pipeline_mode = #tpu.pipeline_mode<synchronous>, transform_indices = @transform_7, window_bounds = array<i64: 4, 128>}, {pipeline_mode = #tpu.pipeline_mode<synchronous>, transform_indices = @transform_8, window_bounds = array<i64: 8, 1>}, {pipeline_mode = #tpu.pipeline_mode<synchronous>, transform_indices = @transform_9, window_bounds = array<i64: 1, 8>}, {transform_indices = @transform_10, window_bounds = array<i64: 8, 128>}]} {
    %c0 = arith.constant 0 : index
    %0 = memref.load %arg1[%c0] : memref<2xf32, #tpu.memory_space<smem>>
    %c1 = arith.constant 1 : index
    %1 = memref.load %arg1[%c1] : memref<2xf32, #tpu.memory_space<smem>>
    %c0_0 = arith.constant 0 : index
    %c0_1 = arith.constant 0 : index
    %2 = vector.load %arg2[%c0_0, %c0_1] : memref<8x128xf32, #tpu.memory_space<vmem>>, vector<8x128xf32>
    %c0_2 = arith.constant 0 : index
    %c0_3 = arith.constant 0 : index
    %3 = vector.load %arg3[%c0_2, %c0_3] : memref<128x256xf32, #tpu.memory_space<vmem>>, vector<128x256xf32>
    %cst = arith.constant dense<0.000000e+00> : vector<8x256xf32>
    %4 = tpu.matmul %2, %3, %cst {dimension_numbers = #tpu.dot_dimension_numbers<[1], [0], [0], [1], [0, 0, 1, 1], [], []>} : vector<8x128xf32>, vector<128x256xf32>, vector<8x256xf32> -> vector<8x256xf32>
    %c0_4 = arith.constant 0 : index
    %c0_5 = arith.constant 0 : index
    %5 = vector.load %arg4[%c0_4, %c0_5] : memref<1x256xf32, #tpu.memory_space<vmem>>, vector<1x256xf32>
    %6 = vector.broadcast %5 : vector<1x256xf32> to vector<8x256xf32>
    %7 = arith.addf %4, %6 : vector<8x256xf32>
    %8 = vector.extract_strided_slice %7 {offsets = [0, 0], sizes = [8, 128], strides = [1, 1]} : vector<8x256xf32> to vector<8x128xf32>
    %9 = vector.extract_strided_slice %7 {offsets = [0, 128], sizes = [8, 128], strides = [1, 1]} : vector<8x256xf32> to vector<8x128xf32>
    %c0_6 = arith.constant 0 : index
    %c0_7 = arith.constant 0 : index
    %10 = vector.load %arg7[%c0_6, %c0_7] : memref<128x4xf32, #tpu.memory_space<vmem>>, vector<128x4xf32>
    %c0_8 = arith.constant 0 : index
    %c0_9 = arith.constant 0 : index
    %11 = vector.load %arg8[%c0_8, %c0_9] : memref<4x128xf32, #tpu.memory_space<vmem>>, vector<4x128xf32>
    %c0_10 = arith.constant 0 : index
    %c0_11 = arith.constant 0 : index
    %12 = vector.load %arg9[%c0_10, %c0_11] : memref<8x1xf32, #tpu.memory_space<vmem>>, vector<8x1xf32>
    %c0_12 = arith.constant 0 : index
    %c0_13 = arith.constant 0 : index
    %13 = vector.load %arg10[%c0_12, %c0_13] : memref<1x8xf32, #tpu.memory_space<vmem>>, vector<1x8xf32>
    %cst_14 = arith.constant dense<0.000000e+00> : vector<1x128xf32>
    %14 = tpu.matmul %13, %8, %cst_14 {dimension_numbers = #tpu.dot_dimension_numbers<[1], [0], [0], [1], [0, 0, 1, 1], [], []>} : vector<1x8xf32>, vector<8x128xf32>, vector<1x128xf32> -> vector<1x128xf32>
    %cst_15 = arith.constant 1.250000e-01 : f32
    %15 = vector.broadcast %cst_15 : f32 to vector<1x128xf32>
    %16 = arith.mulf %14, %15 : vector<1x128xf32>
    %cst_16 = arith.constant dense<0.000000e+00> : vector<1x128xf32>
    %17 = tpu.matmul %13, %9, %cst_16 {dimension_numbers = #tpu.dot_dimension_numbers<[1], [0], [0], [1], [0, 0, 1, 1], [], []>} : vector<1x8xf32>, vector<8x128xf32>, vector<1x128xf32> -> vector<1x128xf32>
    %cst_17 = arith.constant 1.250000e-01 : f32
    %18 = vector.broadcast %cst_17 : f32 to vector<1x128xf32>
    %19 = arith.mulf %17, %18 : vector<1x128xf32>
    %20 = arith.mulf %8, %8 : vector<8x128xf32>
    %cst_18 = arith.constant dense<0.000000e+00> : vector<8x4xf32>
    %21 = tpu.matmul %20, %10, %cst_18 {dimension_numbers = #tpu.dot_dimension_numbers<[1], [0], [0], [1], [0, 0, 1, 1], [], []>} : vector<8x128xf32>, vector<128x4xf32>, vector<8x4xf32> -> vector<8x4xf32>
    %22 = arith.mulf %16, %16 : vector<1x128xf32>
    %cst_19 = arith.constant dense<0.000000e+00> : vector<1x4xf32>
    %23 = tpu.matmul %22, %10, %cst_19 {dimension_numbers = #tpu.dot_dimension_numbers<[1], [0], [0], [1], [0, 0, 1, 1], [], []>} : vector<1x128xf32>, vector<128x4xf32>, vector<1x4xf32> -> vector<1x4xf32>
    %cst_20 = arith.constant 1.000000e-24 : f32
    %24 = vector.broadcast %cst_20 : f32 to vector<8x4xf32>
    %25 = arith.maximumf %21, %24 : vector<8x4xf32>
    %26 = math.rsqrt %25 : vector<8x4xf32>
    %cst_21 = arith.constant 1.000000e-24 : f32
    %27 = vector.broadcast %cst_21 : f32 to vector<1x4xf32>
    %28 = arith.maximumf %23, %27 : vector<1x4xf32>
    %29 = math.rsqrt %28 : vector<1x4xf32>
    %cst_22 = arith.constant dense<0.000000e+00> : vector<1x128xf32>
    %30 = tpu.matmul %29, %11, %cst_22 {dimension_numbers = #tpu.dot_dimension_numbers<[1], [0], [0], [1], [0, 0, 1, 1], [], []>} : vector<1x4xf32>, vector<4x128xf32>, vector<1x128xf32> -> vector<1x128xf32>
    %31 = arith.mulf %16, %30 : vector<1x128xf32>
    %cst_23 = arith.constant dense<0.000000e+00> : vector<8x128xf32>
    %32 = tpu.matmul %12, %31, %cst_23 {dimension_numbers = #tpu.dot_dimension_numbers<[1], [0], [0], [1], [0, 0, 1, 1], [], []>} : vector<8x1xf32>, vector<1x128xf32>, vector<8x128xf32> -> vector<8x128xf32>
    %33 = arith.mulf %8, %32 : vector<8x128xf32>
    %cst_24 = arith.constant dense<0.000000e+00> : vector<8x4xf32>
    %34 = tpu.matmul %33, %10, %cst_24 {dimension_numbers = #tpu.dot_dimension_numbers<[1], [0], [0], [1], [0, 0, 1, 1], [], []>} : vector<8x128xf32>, vector<128x4xf32>, vector<8x4xf32> -> vector<8x4xf32>
    %35 = arith.mulf %34, %26 : vector<8x4xf32>
    %36 = vector.broadcast %0 : f32 to vector<8x4xf32>
    %37 = arith.mulf %36, %35 : vector<8x4xf32>
    %38 = vector.broadcast %1 : f32 to vector<8x4xf32>
    %39 = arith.addf %38, %37 : vector<8x4xf32>
    %cst_25 = arith.constant 0.000000e+00 : f32
    %40 = vector.broadcast %cst_25 : f32 to vector<8x4xf32>
    %41 = arith.maximumf %39, %40 : vector<8x4xf32>
    %cst_26 = arith.constant dense<0.000000e+00> : vector<8x128xf32>
    %42 = tpu.matmul %41, %11, %cst_26 {dimension_numbers = #tpu.dot_dimension_numbers<[1], [0], [0], [1], [0, 0, 1, 1], [], []>} : vector<8x4xf32>, vector<4x128xf32>, vector<8x128xf32> -> vector<8x128xf32>
    %43 = arith.mulf %9, %42 : vector<8x128xf32>
    %cst_27 = arith.constant dense<0.000000e+00> : vector<1x128xf32>
    %44 = tpu.matmul %13, %43, %cst_27 {dimension_numbers = #tpu.dot_dimension_numbers<[1], [0], [0], [1], [0, 0, 1, 1], [], []>} : vector<1x8xf32>, vector<8x128xf32>, vector<1x128xf32> -> vector<1x128xf32>
    %cst_28 = arith.constant dense<0.000000e+00> : vector<1x4xf32>
    %45 = tpu.matmul %13, %41, %cst_28 {dimension_numbers = #tpu.dot_dimension_numbers<[1], [0], [0], [1], [0, 0, 1, 1], [], []>} : vector<1x8xf32>, vector<8x4xf32>, vector<1x4xf32> -> vector<1x4xf32>
    %cst_29 = arith.constant dense<0.000000e+00> : vector<1x128xf32>
    %46 = tpu.matmul %45, %11, %cst_29 {dimension_numbers = #tpu.dot_dimension_numbers<[1], [0], [0], [1], [0, 0, 1, 1], [], []>} : vector<1x4xf32>, vector<4x128xf32>, vector<1x128xf32> -> vector<1x128xf32>
    %cst_30 = arith.constant 1.000000e+00 : f32
    %47 = vector.broadcast %cst_30 : f32 to vector<1x128xf32>
    %48 = arith.addf %46, %47 : vector<1x128xf32>
    %49 = arith.addf %44, %19 : vector<1x128xf32>
    %50 = tpu.reciprocal %48 {approx = true} : vector<1x128xf32> -> vector<1x128xf32>
    %51 = arith.mulf %49, %50 : vector<1x128xf32>
    %cst_31 = arith.constant dense<0.000000e+00> : vector<8x128xf32>
    %52 = tpu.matmul %12, %51, %cst_31 {dimension_numbers = #tpu.dot_dimension_numbers<[1], [0], [0], [1], [0, 0, 1, 1], [], []>} : vector<8x1xf32>, vector<1x128xf32>, vector<8x128xf32> -> vector<8x128xf32>
    %53 = arith.mulf %42, %52 : vector<8x128xf32>
    %c0_32 = arith.constant 0 : index
    %c0_33 = arith.constant 0 : index
    %54 = vector.load %arg5[%c0_32, %c0_33] : memref<128x128xf32, #tpu.memory_space<vmem>>, vector<128x128xf32>
    %cst_34 = arith.constant dense<0.000000e+00> : vector<8x128xf32>
    %55 = tpu.matmul %53, %54, %cst_34 {dimension_numbers = #tpu.dot_dimension_numbers<[1], [0], [0], [1], [0, 0, 1, 1], [], []>} : vector<8x128xf32>, vector<128x128xf32>, vector<8x128xf32> -> vector<8x128xf32>
    %c0_35 = arith.constant 0 : index
    %c0_36 = arith.constant 0 : index
    %56 = vector.load %arg6[%c0_35, %c0_36] : memref<1x128xf32, #tpu.memory_space<vmem>>, vector<1x128xf32>
    %57 = vector.broadcast %56 : vector<1x128xf32> to vector<8x128xf32>
    %58 = arith.addf %55, %57 : vector<8x128xf32>
    %59 = arith.addf %2, %58 : vector<8x128xf32>
    %c0_37 = arith.constant 0 : index
    %c0_38 = arith.constant 0 : index
    %60 = vector.load %arg11[%c0_37, %c0_38] : memref<8x128xf32, #tpu.memory_space<vmem>>, vector<8x128xf32>
    tpu.vector_store %arg11[%c0_37, %c0_38], %59 {strides = array<i32>} : memref<8x128xf32, #tpu.memory_space<vmem>>, vector<8x128xf32>,
    return
  }
  func.func @transform_0(%arg0: i32) -> i32 {
    %c0_i32 = arith.constant 0 : i32
    %c0_i32_0 = arith.constant 0 : i32
    return %c0_i32 : i32
  }
  func.func @transform_1(%arg0: i32) -> (i32, i32) {
    %c0_i32 = arith.constant 0 : i32
    %c0_i32_0 = arith.constant 0 : i32
    return %arg0, %c0_i32 : i32, i32
  }
  func.func @transform_2(%arg0: i32) -> (i32, i32) {
    %c0_i32 = arith.constant 0 : i32
    %c0_i32_0 = arith.constant 0 : i32
    %c0_i32_1 = arith.constant 0 : i32
    return %c0_i32, %c0_i32_0 : i32, i32
  }
  func.func @transform_3(%arg0: i32) -> (i32, i32) {
    %c0_i32 = arith.constant 0 : i32
    %c0_i32_0 = arith.constant 0 : i32
    %c0_i32_1 = arith.constant 0 : i32
    return %c0_i32, %c0_i32_0 : i32, i32
  }
  func.func @transform_4(%arg0: i32) -> (i32, i32) {
    %c0_i32 = arith.constant 0 : i32
    %c0_i32_0 = arith.constant 0 : i32
    %c0_i32_1 = arith.constant 0 : i32
    return %c0_i32, %c0_i32_0 : i32, i32
  }
  func.func @transform_5(%arg0: i32) -> (i32, i32) {
    %c0_i32 = arith.constant 0 : i32
    %c0_i32_0 = arith.constant 0 : i32
    %c0_i32_1 = arith.constant 0 : i32
    return %c0_i32, %c0_i32_0 : i32, i32
  }
  func.func @transform_6(%arg0: i32) -> (i32, i32) {
    %c0_i32 = arith.constant 0 : i32
    %c0_i32_0 = arith.constant 0 : i32
    %c0_i32_1 = arith.constant 0 : i32
    return %c0_i32, %c0_i32_0 : i32, i32
  }
  func.func @transform_7(%arg0: i32) -> (i32, i32) {
    %c0_i32 = arith.constant 0 : i32
    %c0_i32_0 = arith.constant 0 : i32
    %c0_i32_1 = arith.constant 0 : i32
    return %c0_i32, %c0_i32_0 : i32, i32
  }
  func.func @transform_8(%arg0: i32) -> (i32, i32) {
    %c0_i32 = arith.constant 0 : i32
    %c0_i32_0 = arith.constant 0 : i32
    %c0_i32_1 = arith.constant 0 : i32
    return %c0_i32, %c0_i32_0 : i32, i32
  }
  func.func @transform_9(%arg0: i32) -> (i32, i32) {
    %c0_i32 = arith.constant 0 : i32
    %c0_i32_0 = arith.constant 0 : i32
    %c0_i32_1 = arith.constant 0 : i32
    return %c0_i32, %c0_i32_0 : i32, i32
  }
  func.func @transform_10(%arg0: i32) -> (i32, i32) {
    %c0_i32 = arith.constant 0 : i32
    %c0_i32_0 = arith.constant 0 : i32
    return %arg0, %c0_i32 : i32, i32
  }
}

</mosaic_0001>

<bundles_post_ra>
// kernel: tpu_custom_call.1
= control target key start
LH: loop header
LB: loop body
LE: loop exit
PB: predicated region body
PF: predicated region fallthrough
CT: control target
= control target key end

     0   :  { %s2709_s0 = inlined_call_operand.vmem [shape: f32[2], index: 0, kind: input, shape index: {}]   ;;  %s2710_s1 = inlined_call_operand.vmem [shape: f32[16,128], index: 1, kind: input, shape index: {}]   ;;  %s2711_s2 = inlined_call_operand.hbm [shape: f32[128,256], index: 2, kind: input, shape index: {}]   ;;  %s2712_s3 = inlined_call_operand.vmem [shape: f32[1,256], index: 3, kind: input, shape index: {}]   ;;  %s2713_s4 = inlined_call_operand.vmem [shape: f32[128,128], index: 4, kind: input, shape index: {}]   ;;  %s2714_s5 = inlined_call_operand.vmem [shape: f32[1,128], index: 5, kind: input, shape index: {}]   ;;  %s2715_s6 = inlined_call_operand.vmem [shape: f32[128,4], index: 6, kind: input, shape index: {}]   ;;  %s2716_s7 = inlined_call_operand.vmem [shape: f32[4,128], index: 7, kind: input, shape index: {}]   ;;  %s2717_s8 = inlined_call_operand.vmem [shape: f32[8,1], index: 8, kind: input, shape index: {}]   ;;  %s2718_s9 = inlined_call_operand.vmem [shape: f32[1,8], index: 9, kind: input, shape index: {}]   ;;  %s2719_s10 = inlined_call_operand.hbm [shape: f32[16,128], index: 10, kind: output, shape index: {}]  }
   0x1   :  { %2721 = sst [smem:[#allocation11_spill]] %s2709_s0 }
   0x2   :  { %15 = vsyncpa [#allocation5], 0 }
   0x3   :  { %16 = vsyncpa [#allocation3], 0 }
   0x4   :  { %17 = vsyncpa [#allocation4], 0 }
   0x5   :  { %19 = vsyncpa [#allocation4 + $0x1], 0  ;;  %s2280_s13 = smov 0   ;;  %s2282_s14 = smov 0  }
   0x6   :  { %s2284_s15 = smov 0   ;;  %s2286_s16 = smov 0  }
   0x7 LB: > { %s2301_s17 = sadd.s32 4294967295, %s2215_s16   ;;  %s1602_s18 = sadd.s32 4294967294, %s2215_s16   ;;  %s2215_s16 = sphi %s2286_s16, %s2735_s16   ;;  %s2211_s15 = sphi %s2284_s15, %s2734_s15   ;;  %s2207_s14 = sphi %s2282_s14, %s2733_s14   ;;  %s2203_s13 = sphi %s2280_s13, %s2732_s13  }
   0x8   : > { %s2305_s19 = sadd.s32 1, %s2215_s16   ;;  %s247_s20 = sadd.s32 1, %s2211_s15 }
   0x9   : > { %s244_s21 = ssub.s32 %s2215_s16, %s2305_s19  ;;  %p257_p0 = scmp.ne.s32.totalorder %s2211_s15, %s2207_s14 }
   0xa   : > { %p245_p1 = scmp.eq.s32.totalorder %s244_s21, 0  ;;  %p258_p2 = scmp.eq.s32.totalorder %s2301_s17, 1 }
   0xb   : > { %p263_p3 = scmp.ne.s32.totalorder %s2207_s14, %s2203_s13  ;;  %p264_p4 = scmp.eq.s32.totalorder %s1602_s18, 1 }
   0xc   : > { %s2316_s22 = scalar_select %p245_p1, %s2211_s15, %s247_s20  }
   0xd   : > { %p2318_p5 = por %p258_p2, %p257_p0  ;;  %p2322_p6 = por %p264_p4, %p263_p3 }
   0xe   : > { %p1603_p7 = scmp.ge.s32.totalorder %s2215_s16, 1  ;;  %p271_p8 = scmp.lt.s32.totalorder %s2215_s16, 3 }
   0xf   : > { %s2723_s24 = scalar_select %p2322_p6, 1, 0 }
  0x10   : > { %p2720_p9 = scmp.eq.s32.totalorder %s2301_s17, 0  ;;  %p2329_p10 = pnand %p1603_p7, %p271_p8 }
  0x11   : > { %s2725_s0 = sld [smem:[#allocation11_spill]]  ;;  %s2217_s29 = smov [#allocation6]  }
  0x12   : > { %p2041_p11 = pneg %p2329_p10  ;;  %s294_s30 = sshll.u32 %s2217_s29, 4  ;;  %s2344_s30 = int_to_ptr.vmem [resolvable:$true] %s294_s30 }
  0x14   : > { %p2340_p12 = pnand %p2720_p9, %p2041_p11 }
  0x16   : > { %p2104_p0 = pneg %p2340_p12 }
  0x17   : > { %s284_s28 = sshll.u32 %s2725_s0, 4  ;;  %s285_s28 = int_to_ptr.vmem [resolvable:$true] %s284_s28 }
  0x18   : > { %s2102_s12 = scalar_lea.vmem %s285_s28, 16  ;;  %p2110_p3 = scmp.lt.s32.totalorder %s285_s28, %s285_s28 }
  0x19   : > { %p2103_p13 = scmp.ne.s32.totalorder %s285_s28, %s2102_s12  ;;  %p2111_p4 = scmp.lt.s32.totalorder %s2102_s12, %s2102_s12 }
  0x1b   : > { %p2105_p1 = pnand %p2104_p0, %p2103_p13  ;;  %p2112_p7 = por %p2111_p4, %p2110_p3 }
  0x1d   : > { %p2106_p2 = pneg %p2105_p1 }
  0x1f   : > { %p2113_p8 = pnand %p2112_p7, %p2106_p2 }
  0x21   : > { %2116 = shalt.err (!%p2113_p8)
}
  0x22   : > { %s2218_s18 = smov [#allocation2]   ;;  %s2117_s26 = scalar_lea.hbm %s2711_s2, 4096 }
  0x23   : > { %2044 = dma.vmem_to_smem (!%p2340_p12), %s285_s28, 16, %s2218_s18, [#allocation5]  }
  0x24   : > { %p2118_p11 = scmp.ne.s32.totalorder %s2711_s2, %s2117_s26  ;;  %p2124_p2 = scmp.lt.u32.totalorder %s2117_s26, %s2711_s2 }
  0x26   : > { %p2120_p13 = pnand %p2118_p11, %p2104_p0 }
  0x28   : > { %p2121_p1 = pneg %p2120_p13 }
  0x2a   : > { %p2126_p3 = pnand %p2124_p2, %p2121_p1 }
  0x2c   : > { %2129 = shalt.err (!%p2126_p3)
}
  0x2d   : > { %s2130_s28 = scalar_lea.vmem %s2344_s30, 4096  ;;  %p2138_p9 = scmp.lt.s32.totalorder %s2344_s30, %s2344_s30 }
  0x2e   : > { %p2131_p4 = scmp.ne.s32.totalorder %s2344_s30, %s2130_s28  ;;  %p2139_p11 = scmp.lt.s32.totalorder %s2130_s28, %s2130_s28 }
  0x30   : > { %p2133_p7 = pnand %p2131_p4, %p2104_p0  ;;  %p2140_p13 = por %p2139_p11, %p2138_p9 }
  0x32   : > { %p2134_p8 = pneg %p2133_p7 }
  0x34   : > { %p2141_p6 = pnand %p2140_p13, %p2134_p8 }
  0x36   : > { %2144 = shalt.err (!%p2141_p6)
}
  0x37   : > { %s2219_s0 = smov 256   ;;  %s2220_s18 = smov 16  }
  0x38   : > { %2047 = dma.hbm_to_vmem [thread:$0]  (!%p2340_p12), %s2711_s2, 4096, %s2344_s30, [#allocation3], %s2219_s0, %s2219_s0, %s2220_s18  }
  0x39   : > { %338 = sbr.rel (%p2329_p10) target bundleno = 2299 (0x8fb), region = 60  ;;  %p2727_p0 = scmp.eq.s32.totalorder (!%p2329_p10), %s2301_s17, 0 }
  0x40   : > { %2190 = dma.done.wait (%p2727_p0), [#allocation5], 16   ;;  %p2728_p1 = pmov %p2727_p0 }
  0x41   : > { %p2729_p6 = pmov %p2727_p0 }
  0x42   : > { %2192 = vsyncadd (%p2728_p1), [#allocation5], 4294967280 }
  0x43   : > { %2194 = dma.done.wait (%p2729_p6), [#allocation3], 4096   ;;  %p2730_p9 = pmov %p2727_p0 }
  0x45   : > { %2196 = vsyncadd (%p2730_p9), [#allocation3], 4294963200 }
  0x46   : > { %348 = sfence }
  0x47   : > { %v388_v0 = vld [vmem:[#allocation6 + $0x8] sm:$0xff]  ;;  %v390_v1 = vld [vmem:[#allocation6 + $0x18] sm:$0xff]  ;;  %v387_v2 = vld [vmem:[#allocation6] sm:$0xff]  ;;  %v2221_v7 = vmov 0.0   ;;  %p380_p10 = scmp.lt.s32.totalorder %s2301_s17, 1  ;;  %vm2222_vm0 = vmmov 0  }
  0x48   : > { %v1903_v3 = vpack.c.bf16 %v390_v1, %v388_v0  ;;  %v389_v4 = vld [vmem:[#allocation6 + $0x10] sm:$0xff]  ;;  %v392_v5 = vld [vmem:[#allocation6 + $0x28] sm:$0xff]  ;;  %v394_v6 = vld [vmem:[#allocation6 + $0x38] sm:$0xff]  ;;  %495 = vmatprep.mubr.f32.mxu0 %v2221_v7  ;;  %1718 = vmatprep.subr.mxu1 %v2221_v7  ;;  %v2223_v53 = vmov 0.0|0.0   ;;  %vm521_vm1 = vcmask 64512   ;;  %vm817_vm2 = vcmask 1043456  }
  0x49   : > { %v1905_v8 = vpack.c.bf16 %v389_v4, %v387_v2  ;;  %v1907_v9 = vpack.c.bf16 %v394_v6, %v392_v5  ;;  %v391_v10 = vld [vmem:[#allocation6 + $0x20] sm:$0xff]  ;;  %v393_v11 = vld [vmem:[#allocation6 + $0x30] sm:$0xff]  ;;  %v396_v12 = vld [vmem:[#allocation6 + $0x48] sm:$0xff]  ;;  %s381_s25 = scalar_select %p380_p10, %s2301_s17, 1  ;;  %1720 = vmatprep.mubr.msk.f32.mxu1 %vm2222_vm0, %v2221_v7  ;;  %vm813_vm3 = vcmask 31744   ;;  %vm896_vm4 = vcmask 1040384  }
  0x4a   : > { %1904 = vmatprep.subr.bf16.mxu0 %v1903_v3  ;;  %v398_v13 = vld [vmem:[#allocation6 + $0x58] sm:$0xff]  ;;  %v1909_v14 = vpack.c.bf16 %v393_v11, %v391_v10  ;;  %v395_v16 = vld [vmem:[#allocation6 + $0x40] sm:$0xff]  ;;  %v397_v17 = vld [vmem:[#allocation6 + $0x50] sm:$0xff]  ;;  %vm892_vm5 = vcmask 7168   ;;  %s384_s18 = sld [smem:[#allocation2]]  ;;  %s1612_s20 = sld [smem:[#allocation2 + $0x1]] }
  0x4b   : > { %1906 = vmatpush1.bf16.msra.mxu0 %v1905_v8  ;;  %v1911_v15 = vpack.c.bf16 %v398_v13, %v396_v12  ;;  %v400_v18 = vld [vmem:[#allocation6 + $0x68] sm:$0xff]  ;;  %v402_v19 = vld [vmem:[#allocation6 + $0x78] sm:$0xff]  ;;  %v1913_v20 = vpack.c.bf16 %v397_v17, %v395_v16  ;;  %v399_v22 = vld [vmem:[#allocation6 + $0x60] sm:$0xff]  ;;  %s1611_s30 = sshll.u32 %s381_s25, 3  ;;  %v421_v12 = vlaneseq  ;;  %s377_s28 = sand.u32 1, %s2207_s14  }
  0x4c   : > { %1908 = vmatprep.subr.bf16.mxu0 %v1907_v9  ;;  %v1915_v21 = vpack.c.bf16 %v402_v19, %v400_v18  ;;  %v401_v23 = vld [vmem:[#allocation6 + $0x70] sm:$0xff]  ;;  %v404_v24 = vld [vmem:[#allocation6 + $0x88] sm:$0xff]  ;;  %v406_v25 = vld [vmem:[#allocation6 + $0x98] sm:$0xff]  ;;  %s383_s27 = scalar_lea.vmem %s2710_s1, %s1611_s30  ;;  %s1610_s0 = sshll.u32 %s377_s28, 3 }
  0x4d   : > { %v1917_v26 = vpack.c.bf16 %v401_v23, %v399_v22  ;;  %v1919_v27 = vpack.c.bf16 %v406_v25, %v404_v24  ;;  %v403_v28 = vld [vmem:[#allocation6 + $0x80] sm:$0xff]  ;;  %v405_v29 = vld [vmem:[#allocation6 + $0x90] sm:$0xff]  ;;  %v408_v30 = vld [vmem:[#allocation6 + $0xa8] sm:$0xff]  ;;  %v422_v13 = vshrl.u32 %v421_v12, 7  ;;  %s1629_s21 = sshll.u32 %s2301_s17, 7  ;;  %s379_s25 = scalar_lea.vmem [#allocation7], %s1610_s0 }
  0x4e   : > { %v410_v31 = vld [vmem:[#allocation6 + $0xb8] sm:$0xff]  ;;  %v1921_v32 = vpack.c.bf16 %v405_v29, %v403_v28  ;;  %v407_v34 = vld [vmem:[#allocation6 + $0xa0] sm:$0xff]  ;;  %v409_v35 = vld [vmem:[#allocation6 + $0xb0] sm:$0xff]  ;;  %s1519_s30 = sshll.u32 %s379_s25, 4  ;;  %s1506_s29 = scalar_lea.sflag [#allocation4], %s377_s28  ;;  %s2669_s30 = int_to_ptr.vmem [resolvable:$true] %s1519_s30 }
  0x4f   : > { %1910 = vmatpush1.bf16.msra.mxu0 %v1909_v14  ;;  %v1923_v33 = vpack.c.bf16 %v410_v31, %v408_v30  ;;  %v412_v36 = vld [vmem:[#allocation6 + $0xc8] sm:$0xff]  ;;  %v414_v37 = vld [vmem:[#allocation6 + $0xd8] sm:$0xff]  ;;  %v1925_v38 = vpack.c.bf16 %v409_v35, %v407_v34  ;;  %v411_v40 = vld [vmem:[#allocation6 + $0xc0] sm:$0xff]  ;;  %v423_v14 = vsub.s32 0, %v422_v13  ;;  %v427_v16 = vsub.s32 1, %v422_v13  ;;  %s2145_s12 = scalar_lea.vmem %s2669_s30, 128 }
  0x50   : > { %1912 = vmatprep.subr.bf16.mxu0 %v1911_v15  ;;  %v1927_v39 = vpack.c.bf16 %v414_v37, %v412_v36  ;;  %v413_v41 = vld [vmem:[#allocation6 + $0xd0] sm:$0xff]  ;;  %v416_v42 = vld [vmem:[#allocation6 + $0xe8] sm:$0xff]  ;;  %v418_v43 = vld [vmem:[#allocation6 + $0xf8] sm:$0xff]  ;;  %p2146_p12 = scmp.ne.s32.totalorder %s2669_s30, %s2145_s12  ;;  %s2224_s17 = smov [#allocation7]  }
  0x51   : > { %v1929_v44 = vpack.c.bf16 %v413_v41, %v411_v40  ;;  %v1931_v45 = vpack.c.bf16 %v418_v43, %v416_v42  ;;  %v415_v46 = vld [vmem:[#allocation6 + $0xe0] sm:$0xff]  ;;  %v417_v47 = vld [vmem:[#allocation6 + $0xf0] sm:$0xff]  ;;  %v503_v51 = vld [vmem:[%s2715_s6 + $0x8] sm:$0xff]  ;;  %s2149_s0 = sshll.u32 %s2224_s17, 4  ;;  %s2150_s0 = int_to_ptr.vmem [resolvable:$false] %s2149_s0 }
  0x52   : > { %v1933_v48 = vpack.c.bf16 %v417_v47, %v415_v46  ;;  %v2395_v49 = vld [vmem:[%s383_s27] sm:$0xff]  ;;  %v504_v54 = vld [vmem:[%s2715_s6 + $0x10] sm:$0xff]  ;;  %v505_v55 = vld [vmem:[%s2715_s6 + $0x18] sm:$0xff]  ;;  %s2667_s27 = scalar_lea.hbm %s2719_s10, %s1629_s21  ;;  %p2147_p2 = pnand %p2146_p12, %p2318_p5 }
  0x53   : > { %1914 = vmatpush1.bf16.msra.mxu0 %v1913_v20  ;;  %v502_v50 = vld [vmem:[%s2715_s6] sm:$0xff]  ;;  %v2419_v56 = vpack.c.bf16 %v505_v55, %v504_v54  ;;  %v507_v58 = vld [vmem:[%s2715_s6 + $0x28] sm:$0xff]  ;;  %v508_v60 = vld [vmem:[%s2715_s6 + $0x30] sm:$0xff]  ;;  %p2152_p4 = scmp.lt.s32.totalorder %s2669_s30, %s2150_s0 }
  0x54   : > { %1916 = vmatprep.subr.bf16.mxu0 %v1915_v21  ;;  %v2408_v52 = vpack.c.bf16 %v503_v51, %v502_v50  ;;  %v506_v57 = vld [vmem:[%s2715_s6 + $0x20] sm:$0xff]  ;;  %v509_v61 = vld [vmem:[%s2715_s6 + $0x38] sm:$0xff]  ;;  %v511_v0 = vld [vmem:[%s2715_s6 + $0x48] sm:$0xff]  ;;  %p2148_p3 = pneg %p2147_p2 }
  0x55   : > { %v2429_v59 = vpack.c.bf16 %v507_v58, %v506_v57  ;;  %v2439_v62 = vpack.c.bf16 %v509_v61, %v508_v60  ;;  %v510_v63 = vld [vmem:[%s2715_s6 + $0x40] sm:$0xff]  ;;  %v512_v2 = vld [vmem:[%s2715_s6 + $0x50] sm:$0xff]  ;;  %v513_v3 = vld [vmem:[%s2715_s6 + $0x58] sm:$0xff] }
  0x56   : > { %v2449_v1 = vpack.c.bf16 %v511_v0, %v510_v63  ;;  %v2459_v4 = vpack.c.bf16 %v513_v3, %v512_v2  ;;  %v514_v5 = vld [vmem:[%s2715_s6 + $0x60] sm:$0xff]  ;;  %v515_v6 = vld [vmem:[%s2715_s6 + $0x68] sm:$0xff]  ;;  %v516_v9 = vld [vmem:[%s2715_s6 + $0x70] sm:$0xff] }
  0x57   : > { %1918 = vmatpush1.bf16.msra.mxu0 %v1917_v26  ;;  %v2469_v8 = vpack.c.bf16 %v515_v6, %v514_v5  ;;  %v517_v10 = vld [vmem:[%s2715_s6 + $0x78] sm:$0xff]  ;;  %v419_v15 = vld [vmem:[%s2712_s3] sm:$0x3]  ;;  %v1411_v63 = vld [vmem:[%s2713_s4 + $0x8] sm:$0xff] }
  0x58   : > { %1920 = vmatprep.subr.bf16.mxu0 %v1919_v27  ;;  %v2479_v11 = vpack.c.bf16 %v517_v10, %v516_v9  ;;  %v424_v17 = vrot.slane %v419_v15, %v423_v14  ;;  %v428_v18 = vrot.slane %v419_v15, %v427_v16  ;;  %v2491_v22 = vld [vmem:[%s2718_s9] sm:$0x1]  ;;  %v1412_v0 = vld [vmem:[%s2713_s4 + $0x10] sm:$0xff]  ;;  %v1413_v2 = vld [vmem:[%s2713_s4 + $0x18] sm:$0xff] }
  0x59   : > { %v2545_v41 = vld [vmem:[%s2717_s8] sm:$0xff]  ;;  %v2011_v3 = vpack.c.bf16 %v1413_v2, %v1412_v0  ;;  %v1416_v6 = vld [vmem:[%s2713_s4 + $0x30] sm:$0xff]  ;;  %v1421_v14 = vld [vmem:[%s2713_s4 + $0x58] sm:$0xff] }
  0x5a   : > { %v1418_v10 = vld [vmem:[%s2713_s4 + $0x40] sm:$0xff]  ;;  %v1420_v13 = vld [vmem:[%s2713_s4 + $0x50] sm:$0xff] }
  0x5b   : > { %1922 = vmatpush1.bf16.msra.mxu0 %v1921_v32  ;;  %v2023_v15 = vpack.c.bf16 %v1421_v14, %v1420_v13  ;;  %v1422_v16 = vld [vmem:[%s2713_s4 + $0x60] sm:$0xff] }
  0x5c   : > { %1924 = vmatprep.subr.bf16.mxu0 %v1923_v33  ;;  %v2534_v33 = vld [vmem:[%s2716_s7] sm:$0xf] }
  0x5f   : > { %1926 = vmatpush1.bf16.msra.mxu0 %v1925_v38 }
  0x60   : > { %1928 = vmatprep.subr.bf16.mxu0 %v1927_v39 }
  0x63   : > { %1930 = vmatpush1.bf16.msra.mxu0 %v1929_v44 }
  0x64   : > { %1932 = vmatprep.subr.bf16.mxu0 %v1931_v45 }
  0x67   : > { %1934 = vmatpush1.bf16.msra.mxu0 %v1933_v48  ;;  %v1042_v48 = vstv %s384_s18  ;;  %s2151_s18 = scalar_lea.vmem %s2150_s0, 256 }
  0x68   : > { %1959 = vmatprep.subr.bf16.mxu0 %v2223_v53  ;;  %p2153_p7 = scmp.lt.s32.totalorder %s2151_s18, %s2145_s12 }
  0x6a   : > { %496 = vmatmul.mubr.f32.vlgmr.msra.gmra.mrb[0].mxu0 %v2395_v49  ;;  %p2154_p8 = por %p2153_p7, %p2152_p4 }
  0x6b   : > { %1795 = vmatprep.mubr.msk.f32.mxu0 %vm2222_vm0, %v2221_v7  ;;  %1961 = vmatpush3.bf16.msra.mxu0 %v2408_v52 }
  0x6c   : > { %1962 = vmatprep.subr.bf16.mxu0 %v2223_v53  ;;  %p2155_p11 = pnand %p2154_p8, %p2148_p3 }
  0x6f   : > { %1964 = vmatpush3.bf16.msra.mxu0 %v2419_v56 }
  0x70   : > { %1965 = vmatprep.subr.bf16.mxu0 %v2223_v53 }
  0x73   : > { %1967 = vmatpush3.bf16.msra.mxu0 %v2429_v59 }
  0x74   : > { %1968 = vmatprep.subr.bf16.mxu0 %v2223_v53 }
  0x77   : > { %1970 = vmatpush3.bf16.msra.mxu0 %v2439_v62 }
  0x78   : > { %1971 = vmatprep.subr.bf16.mxu0 %v2223_v53 }
  0x7b   : > { %1973 = vmatpush3.bf16.msra.mxu0 %v2449_v1 }
  0x7c   : > { %1974 = vmatprep.subr.bf16.mxu0 %v2223_v53 }
  0x7f   : > { %1976 = vmatpush3.bf16.msra.mxu0 %v2459_v4 }
  0x80   : > { %1977 = vmatprep.subr.bf16.mxu0 %v2223_v53 }
  0x83   : > { %1979 = vmatpush3.bf16.msra.mxu0 %v2469_v8 }
  0x84   : > { %1980 = vmatprep.subr.bf16.mxu0 %v2223_v53 }
  0x87   : > { %1982 = vmatpush3.bf16.msra.mxu0 %v2479_v11 }
  0x88   : > { %2007 = vmatprep.subr.bf16.mxu0 %v2223_v53 }
 0x13d   : > { %v497_v19 = vpop.f32.mrb[0].mxu0 }
 0x13e   : > { %v2486_v20 = vadd.f32 %v497_v19, %v424_v17  ;;  %v499_v21 = vpop.f32.mrb[1].mxu0  ;;  %v1423_v17 = vld [vmem:[%s2713_s4 + $0x68] sm:$0xff] }
 0x13f   : > { %v2493_v23 = vadd.f32 %v499_v21, %v428_v18  ;;  %v2026_v18 = vpack.c.bf16 %v1423_v17, %v1422_v16 }
 0x140   : > { %1719 = vmatpush3.msra.mxu1 %v2486_v20  ;;  %v667_v24 = vmul.f32 %v2486_v20, %v2486_v20 }
 0x141   : > { %1721 = vmatmul.mubr.msk.f32.vlgmr.msra.gmra.mrb[0].mxu1 %vm521_vm1, %v2491_v22  ;;  %1723 = vmatprep.subr.mxu1 %v2221_v7 }
 0x142   : > { %1724 = vmatpush3.msra.mxu1 %v2493_v23  ;;  %1725 = vmatprep.mubr.msk.f32.mxu1 %vm2222_vm0, %v2221_v7 }
 0x143   : > { %1935 = vmatprep.subr.bf16.mxu1 %v2223_v53 }
 0x145   : > { %1726 = vmatmul.mubr.msk.f32.vlgmr.msra.gmra.mrb[2].mxu1 %vm521_vm1, %v2491_v22 }
 0x146   : > { %1937 = vmatpush3.bf16.msra.mxu1 %v2408_v52  ;;  %1760 = vmatprep.mubr.msk.f32.mxu1 %vm2222_vm0, %v2221_v7 }
 0x147   : > { %1938 = vmatprep.subr.bf16.mxu1 %v2223_v53 }
 0x14a   : > { %1940 = vmatpush3.bf16.msra.mxu1 %v2419_v56 }
 0x14b   : > { %1941 = vmatprep.subr.bf16.mxu1 %v2223_v53 }
 0x14e   : > { %1943 = vmatpush3.bf16.msra.mxu1 %v2429_v59 }
 0x14f   : > { %1944 = vmatprep.subr.bf16.mxu1 %v2223_v53 }
 0x152   : > { %1946 = vmatpush3.bf16.msra.mxu1 %v2439_v62 }
 0x153   : > { %1947 = vmatprep.subr.bf16.mxu1 %v2223_v53 }
 0x156   : > { %1949 = vmatpush3.bf16.msra.mxu1 %v2449_v1 }
 0x157   : > { %1950 = vmatprep.subr.bf16.mxu1 %v2223_v53 }
 0x15a   : > { %1952 = vmatpush3.bf16.msra.mxu1 %v2459_v4 }
 0x15b   : > { %1953 = vmatprep.subr.bf16.mxu1 %v2223_v53 }
 0x15e   : > { %1955 = vmatpush3.bf16.msra.mxu1 %v2469_v8 }
 0x15f   : > { %1956 = vmatprep.subr.bf16.mxu1 %v2223_v53 }
 0x162   : > { %1958 = vmatpush3.bf16.msra.mxu1 %v2479_v11 }
 0x163   : > { %1798 = vmatprep.subr.mxu1 %v2221_v7 }
 0x165   : > { %1761 = vmatmul.mubr.f32.vlgmr.msra.gmra.mrb[4].mxu1 %v667_v24 }
 0x166   : > { %1800 = vmatprep.mubr.msk.f32.mxu1 %vm2222_vm0, %v2221_v7  ;;  %1799 = vmatpush3.msk.msra.mxu1 %vm817_vm2, %v2534_v33 }
 0x167   : > { %1803 = vmatprep.subr.mxu1 %v2221_v7 }
 0x214   : > { %v591_v25 = vpop.f32.mrb[0].mxu1 }
 0x215   : > { %v595_v26 = vmul.f32 0.125, %v591_v25  ;;  %v1722_v27 = vpop.f32.mrb[1].mxu1 }
 0x217   : > { %v738_v28 = vmul.f32 %v595_v26, %v595_v26 }
 0x218   : > { %v2527_v29 = vpop.f32.mrb[2].mxu1 }
 0x219   : > { %1796 = vmatmul.mubr.f32.vlgmr.msra.gmra.mrb[2].mxu0 %v738_v28  ;;  %v1727_v30 = vpop.f32.mrb[3].mxu1  ;;  %v1425_v28 = vld [vmem:[%s2713_s4 + $0x78] sm:$0xff] }
 0x21a   : > { %1900 = vmatprep.mubr.msk.f32.mxu0 %vm2222_vm0, %v2221_v7 }
 0x238   : > { %v734_v31 = vpop.f32.mrb[4].mxu1 }
 0x239   : > { %v1762_v32 = vpop.f32.mrb[5].mxu1  ;;  %v809_v45 = vmax.f32 %v734_v31, 1e-24 }
 0x2ec   : > { %v805_v34 = vpop.f32.mrb[2].mxu0 }
 0x2ed   : > { %v811_v35 = vmax.f32 %v805_v34, 1e-24  ;;  %v1797_v36 = vpop.f32.mrb[3].mxu0 }
 0x2ef   : > { %2096 = vrsqrt.f32 %v811_v35 }
 0x2f0   : > { %2098 = vrsqrt.f32 %v809_v45 }
 0x2f9   : > { %v2097_v37 = vpop.eup %2096 }
 0x2fa   : > { %1801 = vmatmul.mubr.msk.f32.vlgmr.msra.gmra.mrb[6].mxu1 %vm813_vm3, %v2097_v37  ;;  %v2099_v46 = vpop.eup %2098 }
 0x2fb   : > { %1805 = vmatprep.mubr.msk.f32.mxu1 %vm2222_vm0, %v2221_v7 }
 0x3cd   : > { %v887_v38 = vpop.f32.mrb[6].mxu1 }
 0x3ce   : > { %v891_v39 = vmul.f32 %v887_v38, %v595_v26  ;;  %v1802_v40 = vpop.f32.mrb[7].mxu1 }
 0x3d0   : > { %1804 = vmatpush3.msk.msra.mxu1 %vm896_vm4, %v891_v39 }
 0x3d1   : > { %1806 = vmatmul.mubr.msk.f32.vlgmr.msra.gmra.mrb[8].mxu1 %vm892_vm5, %v2545_v41  ;;  %1983 = vmatprep.subr.bf16.mxu1 %v2223_v53 }
 0x3d2   : > { %1985 = vmatpush3.bf16.msra.mxu1 %v2408_v52  ;;  %1840 = vmatprep.mubr.msk.f32.mxu1 %vm2222_vm0, %v2221_v7  ;;  %v1044_v52 = vstv %s1612_s20 }
 0x3d3   : > { %1986 = vmatprep.subr.bf16.mxu1 %v2223_v53 }
 0x3d6   : > { %1988 = vmatpush3.bf16.msra.mxu1 %v2419_v56 }
 0x3d7   : > { %1989 = vmatprep.subr.bf16.mxu1 %v2223_v53 }
 0x3da   : > { %1991 = vmatpush3.bf16.msra.mxu1 %v2429_v59 }
 0x3db   : > { %1992 = vmatprep.subr.bf16.mxu1 %v2223_v53 }
 0x3de   : > { %1994 = vmatpush3.bf16.msra.mxu1 %v2439_v62  ;;  %v1410_v62 = vld [vmem:[%s2713_s4] sm:$0xff] }
 0x3df   : > { %1995 = vmatprep.subr.bf16.mxu1 %v2223_v53 }
 0x3e2   : > { %1997 = vmatpush3.bf16.msra.mxu1 %v2449_v1  ;;  %v2008_v1 = vpack.c.bf16 %v1411_v63, %v1410_v62 }
 0x3e3   : > { %1998 = vmatprep.subr.bf16.mxu1 %v2223_v53 }
 0x3e4   : > { %2009 = vmatpush3.bf16.msra.mxu0 %v2008_v1 }
 0x3e5   : > { %2010 = vmatprep.subr.bf16.mxu0 %v2223_v53 }
 0x3e6   : > { %2000 = vmatpush3.bf16.msra.mxu1 %v2459_v4  ;;  %v1415_v4 = vld [vmem:[%s2713_s4 + $0x28] sm:$0xff] }
 0x3e7   : > { %2001 = vmatprep.subr.bf16.mxu1 %v2223_v53 }
 0x3e8   : > { %2012 = vmatpush3.bf16.msra.mxu0 %v2011_v3 }
 0x3e9   : > { %2013 = vmatprep.subr.bf16.mxu0 %v2223_v53 }
 0x3ea   : > { %2003 = vmatpush3.bf16.msra.mxu1 %v2469_v8  ;;  %v1417_v8 = vld [vmem:[%s2713_s4 + $0x38] sm:$0xff] }
 0x3eb   : > { %2004 = vmatprep.subr.bf16.mxu1 %v2223_v53  ;;  %v2017_v9 = vpack.c.bf16 %v1417_v8, %v1416_v6 }
 0x3ee   : > { %2006 = vmatpush3.bf16.msra.mxu1 %v2479_v11  ;;  %v1419_v11 = vld [vmem:[%s2713_s4 + $0x48] sm:$0xff] }
 0x3ef   : > { %1843 = vmatprep.subr.mxu1 %v2221_v7  ;;  %v2020_v12 = vpack.c.bf16 %v1419_v11, %v1418_v10 }
 0x4a4   : > { %v966_v42 = vpop.f32.mrb[8].mxu1 }
 0x4a5   : > { %v970_v43 = vmul.f32 %v966_v42, %v2486_v20  ;;  %v1807_v44 = vpop.f32.mrb[9].mxu1 }
 0x4a7   : > { %1841 = vmatmul.mubr.f32.vlgmr.msra.gmra.mrb[10].mxu1 %v970_v43 }
 0x4a8   : > { %1844 = vmatpush3.msk.msra.mxu1 %vm817_vm2, %v2534_v33  ;;  %1845 = vmatprep.mubr.msk.f32.mxu1 %vm2222_vm0, %v2221_v7 }
 0x4a9   : > { %1848 = vmatprep.subr.mxu1 %v2221_v7 }
 0x57a   : > { %v1037_v47 = vpop.f32.mrb[10].mxu1 }
 0x57b   : > { %v1041_v50 = vmul.f32 %v2099_v46, %v1037_v47  ;;  %v1842_v51 = vpop.f32.mrb[11].mxu1 }
 0x57d   : > { %v1043_v54 = vmul.f32 %v1042_v48, %v1041_v50 }
 0x57f   : > { %v1045_v55 = vadd.f32 %v1044_v52, %v1043_v54 }
 0x581   : > { %v1046_v56 = vmax.f32 %v1045_v55, 0.0 }
 0x583   : > { %1846 = vmatmul.mubr.msk.f32.vlgmr.msra.gmra.mrb[12].mxu1 %vm813_vm3, %v1046_v56 }
 0x584   : > { %1849 = vmatpush3.msra.mxu1 %v1046_v56  ;;  %1850 = vmatprep.mubr.msk.f32.mxu1 %vm2222_vm0, %v2221_v7 }
 0x585   : > { %1853 = vmatprep.subr.mxu1 %v2221_v7 }
 0x587   : > { %1851 = vmatmul.mubr.msk.f32.vlgmr.msra.gmra.mrb[14].mxu1 %vm521_vm1, %v2491_v22 }
 0x588   : > { %1854 = vmatpush3.msk.msra.mxu1 %vm817_vm2, %v2534_v33  ;;  %1855 = vmatprep.mubr.msk.f32.mxu1 %vm2222_vm0, %v2221_v7  ;;  %v1627_v33 = vld [vmem:[%s2714_s5] ss:$0 sm:$0xff] }
 0x589   : > { %1858 = vmatprep.subr.mxu1 %v2221_v7 }
 0x656   : > { %v2586_v57 = vpop.f32.mrb[12].mxu1 }
 0x657   : > { %v1847_v58 = vpop.f32.mrb[13].mxu1  ;;  %v1120_v59 = vmul.f32 %v2586_v57, %v2493_v23 }
 0x65a   : > { %v1187_v60 = vpop.f32.mrb[14].mxu1 }
 0x65b   : > { %v1852_v61 = vpop.f32.mrb[15].mxu1  ;;  %1856 = vmatmul.mubr.msk.f32.vlgmr.msra.gmra.mrb[16].mxu1 %vm813_vm3, %v1187_v60 }
 0x65c   : > { %1859 = vmatpush3.msra.mxu1 %v1120_v59  ;;  %1860 = vmatprep.mubr.msk.f32.mxu1 %vm2222_vm0, %v2221_v7 }
 0x65d   : > { %1863 = vmatprep.subr.mxu1 %v2221_v7 }
 0x65f   : > { %1861 = vmatmul.mubr.msk.f32.vlgmr.msra.gmra.mrb[18].mxu1 %vm521_vm1, %v2491_v22  ;;  %v666_v22 = vmul.f32 0.125, %v2527_v29 }
 0x660   : > { %1865 = vmatprep.mubr.msk.f32.mxu1 %vm2222_vm0, %v2221_v7  ;;  %v1414_v7 = vld [vmem:[%s2713_s4 + $0x20] sm:$0xff] }
 0x661   : > { %v2014_v5 = vpack.c.bf16 %v1415_v4, %v1414_v7 }
 0x663   : > { %2015 = vmatpush3.bf16.msra.mxu0 %v2014_v5 }
 0x664   : > { %2016 = vmatprep.subr.bf16.mxu0 %v2223_v53 }
 0x667   : > { %2018 = vmatpush3.bf16.msra.mxu0 %v2017_v9 }
 0x668   : > { %2019 = vmatprep.subr.bf16.mxu0 %v2223_v53 }
 0x66b   : > { %2021 = vmatpush3.bf16.msra.mxu0 %v2020_v12 }
 0x66c   : > { %2022 = vmatprep.subr.bf16.mxu0 %v2223_v53 }
 0x66f   : > { %2024 = vmatpush3.bf16.msra.mxu0 %v2023_v15 }
 0x670   : > { %2025 = vmatprep.subr.bf16.mxu0 %v2223_v53 }
 0x673   : > { %2027 = vmatpush3.bf16.msra.mxu0 %v2026_v18 }
 0x674   : > { %2028 = vmatprep.subr.bf16.mxu0 %v2223_v53  ;;  %v1424_v53 = vld [vmem:[%s2713_s4 + $0x70] sm:$0xff] }
 0x675   : > { %v2029_v29 = vpack.c.bf16 %v1425_v28, %v1424_v53 }
 0x677   : > { %2030 = vmatpush3.bf16.msra.mxu0 %v2029_v29 }
 0x72e   : > { %v1260_v19 = vpop.f32.mrb[16].mxu1 }
 0x72f   : > { %v1261_v20 = vadd.f32 1.0, %v1260_v19  ;;  %v1857_v21 = vpop.f32.mrb[17].mxu1 }
 0x731   : > { %2100 = vrcp.f32 %v1261_v20 }
 0x732   : > { %v1330_v23 = vpop.f32.mrb[18].mxu1 }
 0x733   : > { %v1331_v24 = vadd.f32 %v1330_v23, %v666_v22  ;;  %v1862_v25 = vpop.f32.mrb[19].mxu1 }
 0x73b   : > { %v2101_v26 = vpop.eup %2100 }
 0x73c   : > { %v1335_v27 = vmul.f32 %v2101_v26, %v1331_v24 }
 0x73e   : > { %1864 = vmatpush3.msk.msra.mxu1 %vm896_vm4, %v1335_v27 }
 0x73f   : > { %1866 = vmatmul.mubr.msk.f32.vlgmr.msra.gmra.mrb[20].mxu1 %vm892_vm5, %v2545_v41 }
 0x812   : > { %v1405_v30 = vpop.f32.mrb[20].mxu1 }
 0x813   : > { %v1409_v31 = vmul.f32 %v1405_v30, %v2586_v57  ;;  %v1867_v32 = vpop.f32.mrb[21].mxu1 }
 0x815   : > { %1901 = vmatmul.mubr.f32.vlgmr.msra.gmra.mrb[4].mxu0 %v1409_v31 }
 0x8e8   : > { %v1499_v34 = vpop.f32.mrb[4].mxu0 }
 0x8e9   : > { %v1500_v35 = vadd.f32 %v1627_v33, %v1499_v34  ;;  %v1902_v36 = vpop.f32.mrb[5].mxu0 }
 0x8eb   : > { %v1503_v37 = vadd.f32 %v1500_v35, %v2395_v49 }
 0x8ed   : > { %1504 = vst [vmem:[%s379_s25] sm:$0xff] %v1503_v37 }
 0x8ee   : > { %2158 = shalt.err (!%p2155_p11)
}
 0x8ef   : > { %s2159_s28 = scalar_lea.hbm %s2667_s27, 128  ;;  %s2163_s25 = scalar_lea.hbm %s2719_s10, 256 }
 0x8f0   : > { %p2160_p13 = scmp.ne.s32.totalorder %s2667_s27, %s2159_s28  ;;  %p2164_p6 = scmp.lt.u32.totalorder %s2667_s27, %s2719_s10 }
 0x8f1   : > { %p2165_p9 = scmp.lt.u32.totalorder %s2163_s25, %s2159_s28  ;;  %p2167_p12 = scmp.lt.u32.totalorder %s2159_s28, %s2667_s27 }
 0x8f2   : > { %p2161_p0 = pnand %p2160_p13, %p2318_p5 }
 0x8f3   : > { %p2166_p10 = por %p2165_p9, %p2164_p6 }
 0x8f4   : > { %p2162_p1 = pneg %p2161_p0 }
 0x8f5   : > { %p2168_p2 = por %p2167_p12, %p2166_p10 }
 0x8f7   : > { %p2169_p3 = pnand %p2168_p2, %p2162_p1 }
 0x8f9   : > { %2172 = shalt.err (!%p2169_p3)
}
 0x8fa   : > { %2039 = dma.vmem_to_hbm [thread:$0]  (%p2318_p5), %s2669_s30, 128, %s2667_s27, %s1506_s29  }
 0x8fb PF: > { %p2056_p4 = scmp.ge.s32.totalorder %s2215_s16, 2  ;;  %s1531_s12 = sand.u32 1, %s2203_s13  }
 0x8fc   : > { %p2731_p7 = scmp.ne.s32.totalorder %s2723_s24, 0  ;;  %s1532_s17 = scalar_lea.sflag [#allocation4], %s1531_s12 }
 0x8fe   : > { %p2049_p8 = pnand %p2056_p4, %p2731_p7 }
 0x900   : > { %2198 = dma.done.wait (!%p2049_p8), %s1532_s17, 128  }
 0x901   : > { %2200 = vsyncadd (!%p2049_p8), %s1532_s17, 4294967168  ;;  %p22_p11 = scmp.ge.s32.totalorder %s2305_s19, 4   ;;  %s2732_s13 = smov %s2207_s14 }
 0x902   : > { %s2733_s14 = smov %s2211_s15  ;;  %s2734_s15 = smov %s2316_s22 }
 0x903   : > { %s2735_s16 = smov %s2305_s19  ;;  %24 = sbr.rel (!%p22_p11) target bundleno = 7 (0x7), region = 105 }
 0x90a   :  { %1537 = vsyncpa [#allocation3], 1 }
 0x90b   :  { %1539 = vsyncpa [#allocation3 + $0x1], 1 }
 0x90c   :  { %1540 = vsyncpa [#allocation4], 1 }
 0x90d   :  { %1542 = vsyncpa [#allocation4 + $0x1], 1 }
 0x90e   :  { %1543 = vsyncpa [#allocation5], 1 }
 0x90f   :  { %1545 = vsyncpa [#allocation5 + $0x1], 1 }

</bundles_post_ra>
